<compile_context>
chip_gen: v7x
topology: tpu7x:2x2x1
jax: 0.10.0
libtpu: 0.0.40
codegen_flags: <defaults>
</compile_context>

<pallas_src>
import numpy as np
import jax
import jax.numpy as jnp
from jax import lax
from jax.experimental import pallas as pl
from jax.experimental.pallas import tpu as pltpu

KH = 5
KW = 5
PAD = 2
OUTC = 3
RG = 8  # output rows per inner step = one f32 sublane tile


def _base_filters() -> np.ndarray:
    """The 3 base 5x5 SRM filters, identical to SRMConv2d._build_kernel (pre-repeat)."""
    filter1 = np.array(
        [[0, 0, 0, 0, 0],
         [0, -1, 2, -1, 0],
         [0, 2, -4, 2, 0],
         [0, -1, 2, -1, 0],
         [0, 0, 0, 0, 0]], dtype=np.float64) / 4.0
    filter2 = np.array(
        [[-1, 2, -2, 2, -1],
         [2, -6, 8, -6, 2],
         [-2, 8, -12, 8, -2],
         [2, -6, 8, -6, 2],
         [-1, 2, -2, 2, -1]], dtype=np.float64) / 12.0
    filter3 = np.array(
        [[0, 0, 0, 0, 0],
         [0, 0, 0, 0, 0],
         [0, 1, -2, 1, 0],
         [0, 0, 0, 0, 0],
         [0, 0, 0, 0, 0]], dtype=np.float64) / 2.0
    return np.stack([filter1, filter2, filter3])  # (3, 5, 5)


def build_srm_weight(inc: int) -> jnp.ndarray:
    """Full (3, inc, 5, 5) SRM bank — only used by the pure-JAX reference check."""
    filters = _base_filters()[:, None, :, :]
    filters = np.repeat(filters, inc, axis=1)
    return jnp.asarray(filters, dtype=jnp.float32)


def _nonzero_taps():
    """Compile-time (ky, kx, weight) taps per output channel, zero weights skipped."""
    base = _base_filters()
    taps = []
    for oc in range(OUTC):
        taps.append(tuple(
            (ky, kx, float(base[oc, ky, kx]))
            for ky in range(KH) for kx in range(KW)
            if base[oc, ky, kx] != 0.0))
    return tuple(taps)


_TAPS = _nonzero_taps()  # 9 + 25 + 3 = 37 taps total


def _srm_kernel(x_ref, o_ref):
    # x_ref: (1, Hp, Wp)      zero-padded, channel-summed image (whole image; its block
    #                         index is independent of h, so it stays resident in VMEM).
    # o_ref: (1, OUTC, TH, W) output tile (TH rows of the image, all 3 SRM channels).
    TH = o_ref.shape[2]
    W = o_ref.shape[3]
    h = pl.program_id(1)
    n_rg = TH // RG

    def row_group(rg, carry):
        row0 = pl.multiple_of(h * TH + rg * RG, RG)
        # All padded input rows needed by RG output rows: a (RG+4, Wp) slab, streamed
        # from VMEM (only this slab + one (RG, W) accumulator are live in vregs).
        slab = x_ref[0, pl.ds(row0, RG + 2 * PAD), :]
        for oc in range(OUTC):
            acc = jnp.zeros((RG, W), dtype=jnp.float32)
            for ky, kx, w in _TAPS[oc]:  # compile-time constant weights, zeros skipped
                acc = acc + w * slab[ky:ky + RG, kx:kx + W]
            # Hardtanh(-3, 3)
            o_ref[0, oc, pl.ds(rg * RG, RG), :] = (
                jnp.clip(acc, -3.0, 3.0).astype(o_ref.dtype))
        return carry

    lax.fori_loop(0, n_rg, row_group, 0, unroll=n_rg <= 4)


def _pick_tile_h(h8: int, cap: int = 256) -> int:
    """Largest multiple-of-RG tile height <= cap that divides the (rounded) image height."""
    if h8 <= cap:
        return h8
    for t in range(cap - cap % RG, RG - 1, -RG):
        if h8 % t == 0:
            return t
    return RG


def srm_conv2d(x: jnp.ndarray) -> jnp.ndarray:
    """SRMConv2d forward: conv2d(x, srm_bank, stride=1, padding=2) then Hardtanh(-3, 3)."""
    N, C, H, W = x.shape

    # The SRM bank repeats the 3 base filters over input channels, so the convolution
    # over C collapses to a single-channel 5x5 stencil over sum_c x.
    xsum = jnp.sum(x.astype(jnp.float32), axis=1)  # (N, H, W)

    H8 = ((H + RG - 1) // RG) * RG  # round H up to a sublane multiple
    Hp = H8 + 2 * PAD
    Wp = W + 2 * PAD
    # Halo padding (padding=2) on the *channel-summed* image (1/C of the raw data);
    # under jit XLA fuses this with the channel sum into a single pass over x.
    # Extra bottom rows (H8 - H) are zeros and their outputs are sliced off below.
    xp = jnp.pad(xsum, ((0, 0), (PAD, PAD + (H8 - H)), (PAD, PAD)))

    TH = _pick_tile_h(H8)
    n_h = H8 // TH

    # VMEM budget: double-buffered input block + double-buffered output block + headroom.
    in_block_bytes = Hp * Wp * 4
    out_block_bytes = OUTC * TH * W * 4
    vmem_limit = 2 * (in_block_bytes + out_block_bytes) + (8 << 20)
    vmem_limit = int(min(max(vmem_limit, 32 << 20), 96 << 20))

    out = pl.pallas_call(
        _srm_kernel,
        out_shape=jax.ShapeDtypeStruct((N, OUTC, H8, W), jnp.float32),
        grid=(N, n_h),
        in_specs=[
            # Whole padded single-channel image per batch element; block index ignores h,
            # so Pallas keeps it resident (no re-DMA) while the H tiles iterate.
            pl.BlockSpec((1, Hp, Wp), lambda n, h: (n, 0, 0)),
        ],
        out_specs=pl.BlockSpec((1, OUTC, TH, W), lambda n, h: (n, 0, h, 0)),
        compiler_params=pltpu.CompilerParams(
            dimension_semantics=("parallel", "parallel"),
            vmem_limit_bytes=vmem_limit,
        ),
    )(xp)

    out = out[:, :, :H, :]
    return out.astype(x.dtype)


def _reference(x, weight):
    # Pure-JAX reference (NCHW conv, pad=2, stride=1, then Hardtanh(-3, 3)).
    out = jax.lax.conv_general_dilated(
        x, weight, window_strides=(1, 1), padding=((PAD, PAD), (PAD, PAD)),
        dimension_numbers=("NCHW", "OIHW", "NCHW"))
    return jnp.clip(out, -3.0, 3.0)


if __name__ == "__main__":
    srm = jax.jit(srm_conv2d)

    key = jax.random.PRNGKey(0)
    N, C, H, W = 2, 4, 16, 16
    # Scale up so Hardtanh actually clips some values.
    x = 4.0 * jax.random.normal(key, (N, C, H, W), dtype=jnp.float32)

    out = jax.block_until_ready(srm(x))
    ref = jax.block_until_ready(_reference(x, build_srm_weight(C)))
    np.testing.assert_allclose(np.asarray(out), np.asarray(ref), rtol=1e-5, atol=1e-4)

    # Second check: odd spatial size (exercises the H-rounding / output-slice path), inc=3.
    x2 = 4.0 * jax.random.normal(jax.random.PRNGKey(0), (1, 3, 10, 12), dtype=jnp.float32)
    out2 = jax.block_until_ready(srm(x2))
    ref2 = jax.block_until_ready(_reference(x2, build_srm_weight(3)))
    np.testing.assert_allclose(np.asarray(out2), np.asarray(ref2), rtol=1e-5, atol=1e-4)

    print("KERNEL_OK")
</pallas_src>

<mosaic_0001>
module attributes {stable_mosaic.version = 11 : i64} {
  func.func @_srm_kernel(%arg0: i32, %arg1: i32, %arg2: memref<1x20x20xf32, #tpu.memory_space<vmem>>, %arg3: memref<1x3x16x16xf32, #tpu.memory_space<vmem>>) attributes {dimension_semantics = [#tpu.dimension_semantics<parallel>, #tpu.dimension_semantics<parallel>], iteration_bounds = array<i64: 2, 1>, scalar_prefetch = 0 : i64, scratch_operands = 0 : i64, tpu.core_type = #tpu.core_type<tc>, window_params = [{transform_indices = @transform_0, window_bounds = array<i64: 1, 20, 20>}, {transform_indices = @transform_1, window_bounds = array<i64: 1, 3, 16, 16>}]} {
    %c0_i32 = arith.constant 0 : i32
    %c16_i32 = arith.constant 16 : i32
    %0 = arith.muli %arg1, %c16_i32 : i32
    %c8_i32 = arith.constant 8 : i32
    %1 = arith.muli %c0_i32, %c8_i32 : i32
    %2 = arith.addi %0, %1 : i32
    %3 = tpu.assume_multiple %2, 8 : i32
    %c0 = arith.constant 0 : index
    %4 = arith.index_cast %3 : i32 to index
    %c0_0 = arith.constant 0 : index
    %5 = vector.load %arg2[%c0, %4, %c0_0] : memref<1x20x20xf32, #tpu.memory_space<vmem>>, vector<1x12x20xf32>
    %6 = vector.shape_cast %5 : vector<1x12x20xf32> to vector<12x20xf32>
    %cst = arith.constant 0.000000e+00 : f32
    %7 = vector.broadcast %cst : f32 to vector<8x16xf32>
    %8 = vector.extract_strided_slice %6 {offsets = [1, 1], sizes = [8, 16], strides = [1, 1]} : vector<12x20xf32> to vector<8x16xf32>
    %cst_1 = arith.constant -2.500000e-01 : f32
    %9 = vector.broadcast %cst_1 : f32 to vector<8x16xf32>
    %10 = arith.mulf %9, %8 : vector<8x16xf32>
    %11 = arith.addf %7, %10 : vector<8x16xf32>
    %12 = vector.extract_strided_slice %6 {offsets = [1, 2], sizes = [8, 16], strides = [1, 1]} : vector<12x20xf32> to vector<8x16xf32>
    %cst_2 = arith.constant 5.000000e-01 : f32
    %13 = vector.broadcast %cst_2 : f32 to vector<8x16xf32>
    %14 = arith.mulf %13, %12 : vector<8x16xf32>
    %15 = arith.addf %11, %14 : vector<8x16xf32>
    %16 = vector.extract_strided_slice %6 {offsets = [1, 3], sizes = [8, 16], strides = [1, 1]} : vector<12x20xf32> to vector<8x16xf32>
    %cst_3 = arith.constant -2.500000e-01 : f32
    %17 = vector.broadcast %cst_3 : f32 to vector<8x16xf32>
    %18 = arith.mulf %17, %16 : vector<8x16xf32>
    %19 = arith.addf %15, %18 : vector<8x16xf32>
    %20 = vector.extract_strided_slice %6 {offsets = [2, 1], sizes = [8, 16], strides = [1, 1]} : vector<12x20xf32> to vector<8x16xf32>
    %cst_4 = arith.constant 5.000000e-01 : f32
    %21 = vector.broadcast %cst_4 : f32 to vector<8x16xf32>
    %22 = arith.mulf %21, %20 : vector<8x16xf32>
    %23 = arith.addf %19, %22 : vector<8x16xf32>
    %24 = vector.extract_strided_slice %6 {offsets = [2, 2], sizes = [8, 16], strides = [1, 1]} : vector<12x20xf32> to vector<8x16xf32>
    %cst_5 = arith.constant -1.000000e+00 : f32
    %25 = vector.broadcast %cst_5 : f32 to vector<8x16xf32>
    %26 = arith.mulf %25, %24 : vector<8x16xf32>
    %27 = arith.addf %23, %26 : vector<8x16xf32>
    %28 = vector.extract_strided_slice %6 {offsets = [2, 3], sizes = [8, 16], strides = [1, 1]} : vector<12x20xf32> to vector<8x16xf32>
    %cst_6 = arith.constant 5.000000e-01 : f32
    %29 = vector.broadcast %cst_6 : f32 to vector<8x16xf32>
    %30 = arith.mulf %29, %28 : vector<8x16xf32>
    %31 = arith.addf %27, %30 : vector<8x16xf32>
    %32 = vector.extract_strided_slice %6 {offsets = [3, 1], sizes = [8, 16], strides = [1, 1]} : vector<12x20xf32> to vector<8x16xf32>
    %cst_7 = arith.constant -2.500000e-01 : f32
    %33 = vector.broadcast %cst_7 : f32 to vector<8x16xf32>
    %34 = arith.mulf %33, %32 : vector<8x16xf32>
    %35 = arith.addf %31, %34 : vector<8x16xf32>
    %36 = vector.extract_strided_slice %6 {offsets = [3, 2], sizes = [8, 16], strides = [1, 1]} : vector<12x20xf32> to vector<8x16xf32>
    %cst_8 = arith.constant 5.000000e-01 : f32
    %37 = vector.broadcast %cst_8 : f32 to vector<8x16xf32>
    %38 = arith.mulf %37, %36 : vector<8x16xf32>
    %39 = arith.addf %35, %38 : vector<8x16xf32>
    %40 = vector.extract_strided_slice %6 {offsets = [3, 3], sizes = [8, 16], strides = [1, 1]} : vector<12x20xf32> to vector<8x16xf32>
    %cst_9 = arith.constant -2.500000e-01 : f32
    %41 = vector.broadcast %cst_9 : f32 to vector<8x16xf32>
    %42 = arith.mulf %41, %40 : vector<8x16xf32>
    %43 = arith.addf %39, %42 : vector<8x16xf32>
    %cst_10 = arith.constant -3.000000e+00 : f32
    %cst_11 = arith.constant 3.000000e+00 : f32
    %44 = vector.broadcast %cst_10 : f32 to vector<8x16xf32>
    %45 = arith.maximumf %44, %43 : vector<8x16xf32>
    %46 = vector.broadcast %cst_11 : f32 to vector<8x16xf32>
    %47 = arith.minimumf %46, %45 : vector<8x16xf32>
    %c8_i32_12 = arith.constant 8 : i32
    %48 = arith.muli %c0_i32, %c8_i32_12 : i32
    %c0_13 = arith.constant 0 : index
    %c0_14 = arith.constant 0 : index
    %49 = arith.index_cast %48 : i32 to index
    %c0_15 = arith.constant 0 : index
    %50 = vector.load %arg3[%c0_13, %c0_14, %49, %c0_15] : memref<1x3x16x16xf32, #tpu.memory_space<vmem>>, vector<1x1x8x16xf32>
    %51 = vector.shape_cast %50 : vector<1x1x8x16xf32> to vector<8x16xf32>
    %52 = vector.shape_cast %47 : vector<8x16xf32> to vector<1x1x8x16xf32>
    tpu.vector_store %arg3[%c0_13, %c0_14, %49, %c0_15], %52 {strides = array<i32>} : memref<1x3x16x16xf32, #tpu.memory_space<vmem>>, vector<1x1x8x16xf32>,
    %cst_16 = arith.constant 0.000000e+00 : f32
    %53 = vector.broadcast %cst_16 : f32 to vector<8x16xf32>
    %54 = vector.extract_strided_slice %6 {offsets = [0, 0], sizes = [8, 16], strides = [1, 1]} : vector<12x20xf32> to vector<8x16xf32>
    %cst_17 = arith.constant -0.0833333358 : f32
    %55 = vector.broadcast %cst_17 : f32 to vector<8x16xf32>
    %56 = arith.mulf %55, %54 : vector<8x16xf32>
    %57 = arith.addf %53, %56 : vector<8x16xf32>
    %58 = vector.extract_strided_slice %6 {offsets = [0, 1], sizes = [8, 16], strides = [1, 1]} : vector<12x20xf32> to vector<8x16xf32>
    %cst_18 = arith.constant 0.166666672 : f32
    %59 = vector.broadcast %cst_18 : f32 to vector<8x16xf32>
    %60 = arith.mulf %59, %58 : vector<8x16xf32>
    %61 = arith.addf %57, %60 : vector<8x16xf32>
    %62 = vector.extract_strided_slice %6 {offsets = [0, 2], sizes = [8, 16], strides = [1, 1]} : vector<12x20xf32> to vector<8x16xf32>
    %cst_19 = arith.constant -0.166666672 : f32
    %63 = vector.broadcast %cst_19 : f32 to vector<8x16xf32>
    %64 = arith.mulf %63, %62 : vector<8x16xf32>
    %65 = arith.addf %61, %64 : vector<8x16xf32>
    %66 = vector.extract_strided_slice %6 {offsets = [0, 3], sizes = [8, 16], strides = [1, 1]} : vector<12x20xf32> to vector<8x16xf32>
    %cst_20 = arith.constant 0.166666672 : f32
    %67 = vector.broadcast %cst_20 : f32 to vector<8x16xf32>
    %68 = arith.mulf %67, %66 : vector<8x16xf32>
    %69 = arith.addf %65, %68 : vector<8x16xf32>
    %70 = vector.extract_strided_slice %6 {offsets = [0, 4], sizes = [8, 16], strides = [1, 1]} : vector<12x20xf32> to vector<8x16xf32>
    %cst_21 = arith.constant -0.0833333358 : f32
    %71 = vector.broadcast %cst_21 : f32 to vector<8x16xf32>
    %72 = arith.mulf %71, %70 : vector<8x16xf32>
    %73 = arith.addf %69, %72 : vector<8x16xf32>
    %74 = vector.extract_strided_slice %6 {offsets = [1, 0], sizes = [8, 16], strides = [1, 1]} : vector<12x20xf32> to vector<8x16xf32>
    %cst_22 = arith.constant 0.166666672 : f32
    %75 = vector.broadcast %cst_22 : f32 to vector<8x16xf32>
    %76 = arith.mulf %75, %74 : vector<8x16xf32>
    %77 = arith.addf %73, %76 : vector<8x16xf32>
    %78 = vector.extract_strided_slice %6 {offsets = [1, 1], sizes = [8, 16], strides = [1, 1]} : vector<12x20xf32> to vector<8x16xf32>
    %cst_23 = arith.constant -5.000000e-01 : f32
    %79 = vector.broadcast %cst_23 : f32 to vector<8x16xf32>
    %80 = arith.mulf %79, %78 : vector<8x16xf32>
    %81 = arith.addf %77, %80 : vector<8x16xf32>
    %82 = vector.extract_strided_slice %6 {offsets = [1, 2], sizes = [8, 16], strides = [1, 1]} : vector<12x20xf32> to vector<8x16xf32>
    %cst_24 = arith.constant 0.666666686 : f32
    %83 = vector.broadcast %cst_24 : f32 to vector<8x16xf32>
    %84 = arith.mulf %83, %82 : vector<8x16xf32>
    %85 = arith.addf %81, %84 : vector<8x16xf32>
    %86 = vector.extract_strided_slice %6 {offsets = [1, 3], sizes = [8, 16], strides = [1, 1]} : vector<12x20xf32> to vector<8x16xf32>
    %cst_25 = arith.constant -5.000000e-01 : f32
    %87 = vector.broadcast %cst_25 : f32 to vector<8x16xf32>
    %88 = arith.mulf %87, %86 : vector<8x16xf32>
    %89 = arith.addf %85, %88 : vector<8x16xf32>
    %90 = vector.extract_strided_slice %6 {offsets = [1, 4], sizes = [8, 16], strides = [1, 1]} : vector<12x20xf32> to vector<8x16xf32>
    %cst_26 = arith.constant 0.166666672 : f32
    %91 = vector.broadcast %cst_26 : f32 to vector<8x16xf32>
    %92 = arith.mulf %91, %90 : vector<8x16xf32>
    %93 = arith.addf %89, %92 : vector<8x16xf32>
    %94 = vector.extract_strided_slice %6 {offsets = [2, 0], sizes = [8, 16], strides = [1, 1]} : vector<12x20xf32> to vector<8x16xf32>
    %cst_27 = arith.constant -0.166666672 : f32
    %95 = vector.broadcast %cst_27 : f32 to vector<8x16xf32>
    %96 = arith.mulf %95, %94 : vector<8x16xf32>
    %97 = arith.addf %93, %96 : vector<8x16xf32>
    %98 = vector.extract_strided_slice %6 {offsets = [2, 1], sizes = [8, 16], strides = [1, 1]} : vector<12x20xf32> to vector<8x16xf32>
    %cst_28 = arith.constant 0.666666686 : f32
    %99 = vector.broadcast %cst_28 : f32 to vector<8x16xf32>
    %100 = arith.mulf %99, %98 : vector<8x16xf32>
    %101 = arith.addf %97, %100 : vector<8x16xf32>
    %102 = vector.extract_strided_slice %6 {offsets = [2, 2], sizes = [8, 16], strides = [1, 1]} : vector<12x20xf32> to vector<8x16xf32>
    %cst_29 = arith.constant -1.000000e+00 : f32
    %103 = vector.broadcast %cst_29 : f32 to vector<8x16xf32>
    %104 = arith.mulf %103, %102 : vector<8x16xf32>
    %105 = arith.addf %101, %104 : vector<8x16xf32>
    %106 = vector.extract_strided_slice %6 {offsets = [2, 3], sizes = [8, 16], strides = [1, 1]} : vector<12x20xf32> to vector<8x16xf32>
    %cst_30 = arith.constant 0.666666686 : f32
    %107 = vector.broadcast %cst_30 : f32 to vector<8x16xf32>
    %108 = arith.mulf %107, %106 : vector<8x16xf32>
    %109 = arith.addf %105, %108 : vector<8x16xf32>
    %110 = vector.extract_strided_slice %6 {offsets = [2, 4], sizes = [8, 16], strides = [1, 1]} : vector<12x20xf32> to vector<8x16xf32>
    %cst_31 = arith.constant -0.166666672 : f32
    %111 = vector.broadcast %cst_31 : f32 to vector<8x16xf32>
    %112 = arith.mulf %111, %110 : vector<8x16xf32>
    %113 = arith.addf %109, %112 : vector<8x16xf32>
    %114 = vector.extract_strided_slice %6 {offsets = [3, 0], sizes = [8, 16], strides = [1, 1]} : vector<12x20xf32> to vector<8x16xf32>
    %cst_32 = arith.constant 0.166666672 : f32
    %115 = vector.broadcast %cst_32 : f32 to vector<8x16xf32>
    %116 = arith.mulf %115, %114 : vector<8x16xf32>
    %117 = arith.addf %113, %116 : vector<8x16xf32>
    %118 = vector.extract_strided_slice %6 {offsets = [3, 1], sizes = [8, 16], strides = [1, 1]} : vector<12x20xf32> to vector<8x16xf32>
    %cst_33 = arith.constant -5.000000e-01 : f32
    %119 = vector.broadcast %cst_33 : f32 to vector<8x16xf32>
    %120 = arith.mulf %119, %118 : vector<8x16xf32>
    %121 = arith.addf %117, %120 : vector<8x16xf32>
    %122 = vector.extract_strided_slice %6 {offsets = [3, 2], sizes = [8, 16], strides = [1, 1]} : vector<12x20xf32> to vector<8x16xf32>
    %cst_34 = arith.constant 0.666666686 : f32
    %123 = vector.broadcast %cst_34 : f32 to vector<8x16xf32>
    %124 = arith.mulf %123, %122 : vector<8x16xf32>
    %125 = arith.addf %121, %124 : vector<8x16xf32>
    %126 = vector.extract_strided_slice %6 {offsets = [3, 3], sizes = [8, 16], strides = [1, 1]} : vector<12x20xf32> to vector<8x16xf32>
    %cst_35 = arith.constant -5.000000e-01 : f32
    %127 = vector.broadcast %cst_35 : f32 to vector<8x16xf32>
    %128 = arith.mulf %127, %126 : vector<8x16xf32>
    %129 = arith.addf %125, %128 : vector<8x16xf32>
    %130 = vector.extract_strided_slice %6 {offsets = [3, 4], sizes = [8, 16], strides = [1, 1]} : vector<12x20xf32> to vector<8x16xf32>
    %cst_36 = arith.constant 0.166666672 : f32
    %131 = vector.broadcast %cst_36 : f32 to vector<8x16xf32>
    %132 = arith.mulf %131, %130 : vector<8x16xf32>
    %133 = arith.addf %129, %132 : vector<8x16xf32>
    %134 = vector.extract_strided_slice %6 {offsets = [4, 0], sizes = [8, 16], strides = [1, 1]} : vector<12x20xf32> to vector<8x16xf32>
    %cst_37 = arith.constant -0.0833333358 : f32
    %135 = vector.broadcast %cst_37 : f32 to vector<8x16xf32>
    %136 = arith.mulf %135, %134 : vector<8x16xf32>
    %137 = arith.addf %133, %136 : vector<8x16xf32>
    %138 = vector.extract_strided_slice %6 {offsets = [4, 1], sizes = [8, 16], strides = [1, 1]} : vector<12x20xf32> to vector<8x16xf32>
    %cst_38 = arith.constant 0.166666672 : f32
    %139 = vector.broadcast %cst_38 : f32 to vector<8x16xf32>
    %140 = arith.mulf %139, %138 : vector<8x16xf32>
    %141 = arith.addf %137, %140 : vector<8x16xf32>
    %142 = vector.extract_strided_slice %6 {offsets = [4, 2], sizes = [8, 16], strides = [1, 1]} : vector<12x20xf32> to vector<8x16xf32>
    %cst_39 = arith.constant -0.166666672 : f32
    %143 = vector.broadcast %cst_39 : f32 to vector<8x16xf32>
    %144 = arith.mulf %143, %142 : vector<8x16xf32>
    %145 = arith.addf %141, %144 : vector<8x16xf32>
    %146 = vector.extract_strided_slice %6 {offsets = [4, 3], sizes = [8, 16], strides = [1, 1]} : vector<12x20xf32> to vector<8x16xf32>
    %cst_40 = arith.constant 0.166666672 : f32
    %147 = vector.broadcast %cst_40 : f32 to vector<8x16xf32>
    %148 = arith.mulf %147, %146 : vector<8x16xf32>
    %149 = arith.addf %145, %148 : vector<8x16xf32>
    %150 = vector.extract_strided_slice %6 {offsets = [4, 4], sizes = [8, 16], strides = [1, 1]} : vector<12x20xf32> to vector<8x16xf32>
    %cst_41 = arith.constant -0.0833333358 : f32
    %151 = vector.broadcast %cst_41 : f32 to vector<8x16xf32>
    %152 = arith.mulf %151, %150 : vector<8x16xf32>
    %153 = arith.addf %149, %152 : vector<8x16xf32>
    %cst_42 = arith.constant -3.000000e+00 : f32
    %cst_43 = arith.constant 3.000000e+00 : f32
    %154 = vector.broadcast %cst_42 : f32 to vector<8x16xf32>
    %155 = arith.maximumf %154, %153 : vector<8x16xf32>
    %156 = vector.broadcast %cst_43 : f32 to vector<8x16xf32>
    %157 = arith.minimumf %156, %155 : vector<8x16xf32>
    %c8_i32_44 = arith.constant 8 : i32
    %158 = arith.muli %c0_i32, %c8_i32_44 : i32
    %c0_45 = arith.constant 0 : index
    %c1 = arith.constant 1 : index
    %159 = arith.index_cast %158 : i32 to index
    %c0_46 = arith.constant 0 : index
    %160 = vector.load %arg3[%c0_45, %c1, %159, %c0_46] : memref<1x3x16x16xf32, #tpu.memory_space<vmem>>, vector<1x1x8x16xf32>
    %161 = vector.shape_cast %160 : vector<1x1x8x16xf32> to vector<8x16xf32>
    %162 = vector.shape_cast %157 : vector<8x16xf32> to vector<1x1x8x16xf32>
    tpu.vector_store %arg3[%c0_45, %c1, %159, %c0_46], %162 {strides = array<i32>} : memref<1x3x16x16xf32, #tpu.memory_space<vmem>>, vector<1x1x8x16xf32>,
    %cst_47 = arith.constant 0.000000e+00 : f32
    %163 = vector.broadcast %cst_47 : f32 to vector<8x16xf32>
    %164 = vector.extract_strided_slice %6 {offsets = [2, 1], sizes = [8, 16], strides = [1, 1]} : vector<12x20xf32> to vector<8x16xf32>
    %cst_48 = arith.constant 5.000000e-01 : f32
    %165 = vector.broadcast %cst_48 : f32 to vector<8x16xf32>
    %166 = arith.mulf %165, %164 : vector<8x16xf32>
    %167 = arith.addf %163, %166 : vector<8x16xf32>
    %168 = vector.extract_strided_slice %6 {offsets = [2, 2], sizes = [8, 16], strides = [1, 1]} : vector<12x20xf32> to vector<8x16xf32>
    %cst_49 = arith.constant -1.000000e+00 : f32
    %169 = vector.broadcast %cst_49 : f32 to vector<8x16xf32>
    %170 = arith.mulf %169, %168 : vector<8x16xf32>
    %171 = arith.addf %167, %170 : vector<8x16xf32>
    %172 = vector.extract_strided_slice %6 {offsets = [2, 3], sizes = [8, 16], strides = [1, 1]} : vector<12x20xf32> to vector<8x16xf32>
    %cst_50 = arith.constant 5.000000e-01 : f32
    %173 = vector.broadcast %cst_50 : f32 to vector<8x16xf32>
    %174 = arith.mulf %173, %172 : vector<8x16xf32>
    %175 = arith.addf %171, %174 : vector<8x16xf32>
    %cst_51 = arith.constant -3.000000e+00 : f32
    %cst_52 = arith.constant 3.000000e+00 : f32
    %176 = vector.broadcast %cst_51 : f32 to vector<8x16xf32>
    %177 = arith.maximumf %176, %175 : vector<8x16xf32>
    %178 = vector.broadcast %cst_52 : f32 to vector<8x16xf32>
    %179 = arith.minimumf %178, %177 : vector<8x16xf32>
    %c8_i32_53 = arith.constant 8 : i32
    %180 = arith.muli %c0_i32, %c8_i32_53 : i32
    %c0_54 = arith.constant 0 : index
    %c2 = arith.constant 2 : index
    %181 = arith.index_cast %180 : i32 to index
    %c0_55 = arith.constant 0 : index
    %182 = vector.load %arg3[%c0_54, %c2, %181, %c0_55] : memref<1x3x16x16xf32, #tpu.memory_space<vmem>>, vector<1x1x8x16xf32>
    %183 = vector.shape_cast %182 : vector<1x1x8x16xf32> to vector<8x16xf32>
    %184 = vector.shape_cast %179 : vector<8x16xf32> to vector<1x1x8x16xf32>
    tpu.vector_store %arg3[%c0_54, %c2, %181, %c0_55], %184 {strides = array<i32>} : memref<1x3x16x16xf32, #tpu.memory_space<vmem>>, vector<1x1x8x16xf32>,
    %c1_i32 = arith.constant 1 : i32
    %c16_i32_56 = arith.constant 16 : i32
    %185 = arith.muli %arg1, %c16_i32_56 : i32
    %c8_i32_57 = arith.constant 8 : i32
    %186 = arith.muli %c1_i32, %c8_i32_57 : i32
    %187 = arith.addi %185, %186 : i32
    %188 = tpu.assume_multiple %187, 8 : i32
    %c0_58 = arith.constant 0 : index
    %189 = arith.index_cast %188 : i32 to index
    %c0_59 = arith.constant 0 : index
    %190 = vector.load %arg2[%c0_58, %189, %c0_59] : memref<1x20x20xf32, #tpu.memory_space<vmem>>, vector<1x12x20xf32>
    %191 = vector.shape_cast %190 : vector<1x12x20xf32> to vector<12x20xf32>
    %cst_60 = arith.constant 0.000000e+00 : f32
    %192 = vector.broadcast %cst_60 : f32 to vector<8x16xf32>
    %193 = vector.extract_strided_slice %191 {offsets = [1, 1], sizes = [8, 16], strides = [1, 1]} : vector<12x20xf32> to vector<8x16xf32>
    %cst_61 = arith.constant -2.500000e-01 : f32
    %194 = vector.broadcast %cst_61 : f32 to vector<8x16xf32>
    %195 = arith.mulf %194, %193 : vector<8x16xf32>
    %196 = arith.addf %192, %195 : vector<8x16xf32>
    %197 = vector.extract_strided_slice %191 {offsets = [1, 2], sizes = [8, 16], strides = [1, 1]} : vector<12x20xf32> to vector<8x16xf32>
    %cst_62 = arith.constant 5.000000e-01 : f32
    %198 = vector.broadcast %cst_62 : f32 to vector<8x16xf32>
    %199 = arith.mulf %198, %197 : vector<8x16xf32>
    %200 = arith.addf %196, %199 : vector<8x16xf32>
    %201 = vector.extract_strided_slice %191 {offsets = [1, 3], sizes = [8, 16], strides = [1, 1]} : vector<12x20xf32> to vector<8x16xf32>
    %cst_63 = arith.constant -2.500000e-01 : f32
    %202 = vector.broadcast %cst_63 : f32 to vector<8x16xf32>
    %203 = arith.mulf %202, %201 : vector<8x16xf32>
    %204 = arith.addf %200, %203 : vector<8x16xf32>
    %205 = vector.extract_strided_slice %191 {offsets = [2, 1], sizes = [8, 16], strides = [1, 1]} : vector<12x20xf32> to vector<8x16xf32>
    %cst_64 = arith.constant 5.000000e-01 : f32
    %206 = vector.broadcast %cst_64 : f32 to vector<8x16xf32>
    %207 = arith.mulf %206, %205 : vector<8x16xf32>
    %208 = arith.addf %204, %207 : vector<8x16xf32>
    %209 = vector.extract_strided_slice %191 {offsets = [2, 2], sizes = [8, 16], strides = [1, 1]} : vector<12x20xf32> to vector<8x16xf32>
    %cst_65 = arith.constant -1.000000e+00 : f32
    %210 = vector.broadcast %cst_65 : f32 to vector<8x16xf32>
    %211 = arith.mulf %210, %209 : vector<8x16xf32>
    %212 = arith.addf %208, %211 : vector<8x16xf32>
    %213 = vector.extract_strided_slice %191 {offsets = [2, 3], sizes = [8, 16], strides = [1, 1]} : vector<12x20xf32> to vector<8x16xf32>
    %cst_66 = arith.constant 5.000000e-01 : f32
    %214 = vector.broadcast %cst_66 : f32 to vector<8x16xf32>
    %215 = arith.mulf %214, %213 : vector<8x16xf32>
    %216 = arith.addf %212, %215 : vector<8x16xf32>
    %217 = vector.extract_strided_slice %191 {offsets = [3, 1], sizes = [8, 16], strides = [1, 1]} : vector<12x20xf32> to vector<8x16xf32>
    %cst_67 = arith.constant -2.500000e-01 : f32
    %218 = vector.broadcast %cst_67 : f32 to vector<8x16xf32>
    %219 = arith.mulf %218, %217 : vector<8x16xf32>
    %220 = arith.addf %216, %219 : vector<8x16xf32>
    %221 = vector.extract_strided_slice %191 {offsets = [3, 2], sizes = [8, 16], strides = [1, 1]} : vector<12x20xf32> to vector<8x16xf32>
    %cst_68 = arith.constant 5.000000e-01 : f32
    %222 = vector.broadcast %cst_68 : f32 to vector<8x16xf32>
    %223 = arith.mulf %222, %221 : vector<8x16xf32>
    %224 = arith.addf %220, %223 : vector<8x16xf32>
    %225 = vector.extract_strided_slice %191 {offsets = [3, 3], sizes = [8, 16], strides = [1, 1]} : vector<12x20xf32> to vector<8x16xf32>
    %cst_69 = arith.constant -2.500000e-01 : f32
    %226 = vector.broadcast %cst_69 : f32 to vector<8x16xf32>
    %227 = arith.mulf %226, %225 : vector<8x16xf32>
    %228 = arith.addf %224, %227 : vector<8x16xf32>
    %cst_70 = arith.constant -3.000000e+00 : f32
    %cst_71 = arith.constant 3.000000e+00 : f32
    %229 = vector.broadcast %cst_70 : f32 to vector<8x16xf32>
    %230 = arith.maximumf %229, %228 : vector<8x16xf32>
    %231 = vector.broadcast %cst_71 : f32 to vector<8x16xf32>
    %232 = arith.minimumf %231, %230 : vector<8x16xf32>
    %c8_i32_72 = arith.constant 8 : i32
    %233 = arith.muli %c1_i32, %c8_i32_72 : i32
    %c0_73 = arith.constant 0 : index
    %c0_74 = arith.constant 0 : index
    %234 = arith.index_cast %233 : i32 to index
    %c0_75 = arith.constant 0 : index
    %235 = vector.load %arg3[%c0_73, %c0_74, %234, %c0_75] : memref<1x3x16x16xf32, #tpu.memory_space<vmem>>, vector<1x1x8x16xf32>
    %236 = vector.shape_cast %235 : vector<1x1x8x16xf32> to vector<8x16xf32>
    %237 = vector.shape_cast %232 : vector<8x16xf32> to vector<1x1x8x16xf32>
    tpu.vector_store %arg3[%c0_73, %c0_74, %234, %c0_75], %237 {strides = array<i32>} : memref<1x3x16x16xf32, #tpu.memory_space<vmem>>, vector<1x1x8x16xf32>,
    %cst_76 = arith.constant 0.000000e+00 : f32
    %238 = vector.broadcast %cst_76 : f32 to vector<8x16xf32>
    %239 = vector.extract_strided_slice %191 {offsets = [0, 0], sizes = [8, 16], strides = [1, 1]} : vector<12x20xf32> to vector<8x16xf32>
    %cst_77 = arith.constant -0.0833333358 : f32
    %240 = vector.broadcast %cst_77 : f32 to vector<8x16xf32>
    %241 = arith.mulf %240, %239 : vector<8x16xf32>
    %242 = arith.addf %238, %241 : vector<8x16xf32>
    %243 = vector.extract_strided_slice %191 {offsets = [0, 1], sizes = [8, 16], strides = [1, 1]} : vector<12x20xf32> to vector<8x16xf32>
    %cst_78 = arith.constant 0.166666672 : f32
    %244 = vector.broadcast %cst_78 : f32 to vector<8x16xf32>
    %245 = arith.mulf %244, %243 : vector<8x16xf32>
    %246 = arith.addf %242, %245 : vector<8x16xf32>
    %247 = vector.extract_strided_slice %191 {offsets = [0, 2], sizes = [8, 16], strides = [1, 1]} : vector<12x20xf32> to vector<8x16xf32>
    %cst_79 = arith.constant -0.166666672 : f32
    %248 = vector.broadcast %cst_79 : f32 to vector<8x16xf32>
    %249 = arith.mulf %248, %247 : vector<8x16xf32>
    %250 = arith.addf %246, %249 : vector<8x16xf32>
    %251 = vector.extract_strided_slice %191 {offsets = [0, 3], sizes = [8, 16], strides = [1, 1]} : vector<12x20xf32> to vector<8x16xf32>
    %cst_80 = arith.constant 0.166666672 : f32
    %252 = vector.broadcast %cst_80 : f32 to vector<8x16xf32>
    %253 = arith.mulf %252, %251 : vector<8x16xf32>
    %254 = arith.addf %250, %253 : vector<8x16xf32>
    %255 = vector.extract_strided_slice %191 {offsets = [0, 4], sizes = [8, 16], strides = [1, 1]} : vector<12x20xf32> to vector<8x16xf32>
    %cst_81 = arith.constant -0.0833333358 : f32
    %256 = vector.broadcast %cst_81 : f32 to vector<8x16xf32>
    %257 = arith.mulf %256, %255 : vector<8x16xf32>
    %258 = arith.addf %254, %257 : vector<8x16xf32>
    %259 = vector.extract_strided_slice %191 {offsets = [1, 0], sizes = [8, 16], strides = [1, 1]} : vector<12x20xf32> to vector<8x16xf32>
    %cst_82 = arith.constant 0.166666672 : f32
    %260 = vector.broadcast %cst_82 : f32 to vector<8x16xf32>
    %261 = arith.mulf %260, %259 : vector<8x16xf32>
    %262 = arith.addf %258, %261 : vector<8x16xf32>
    %263 = vector.extract_strided_slice %191 {offsets = [1, 1], sizes = [8, 16], strides = [1, 1]} : vector<12x20xf32> to vector<8x16xf32>
    %cst_83 = arith.constant -5.000000e-01 : f32
    %264 = vector.broadcast %cst_83 : f32 to vector<8x16xf32>
    %265 = arith.mulf %264, %263 : vector<8x16xf32>
    %266 = arith.addf %262, %265 : vector<8x16xf32>
    %267 = vector.extract_strided_slice %191 {offsets = [1, 2], sizes = [8, 16], strides = [1, 1]} : vector<12x20xf32> to vector<8x16xf32>
    %cst_84 = arith.constant 0.666666686 : f32
    %268 = vector.broadcast %cst_84 : f32 to vector<8x16xf32>
    %269 = arith.mulf %268, %267 : vector<8x16xf32>
    %270 = arith.addf %266, %269 : vector<8x16xf32>
    %271 = vector.extract_strided_slice %191 {offsets = [1, 3], sizes = [8, 16], strides = [1, 1]} : vector<12x20xf32> to vector<8x16xf32>
    %cst_85 = arith.constant -5.000000e-01 : f32
    %272 = vector.broadcast %cst_85 : f32 to vector<8x16xf32>
    %273 = arith.mulf %272, %271 : vector<8x16xf32>
    %274 = arith.addf %270, %273 : vector<8x16xf32>
    %275 = vector.extract_strided_slice %191 {offsets = [1, 4], sizes = [8, 16], strides = [1, 1]} : vector<12x20xf32> to vector<8x16xf32>
    %cst_86 = arith.constant 0.166666672 : f32
    %276 = vector.broadcast %cst_86 : f32 to vector<8x16xf32>
    %277 = arith.mulf %276, %275 : vector<8x16xf32>
    %278 = arith.addf %274, %277 : vector<8x16xf32>
    %279 = vector.extract_strided_slice %191 {offsets = [2, 0], sizes = [8, 16], strides = [1, 1]} : vector<12x20xf32> to vector<8x16xf32>
    %cst_87 = arith.constant -0.166666672 : f32
    %280 = vector.broadcast %cst_87 : f32 to vector<8x16xf32>
    %281 = arith.mulf %280, %279 : vector<8x16xf32>
    %282 = arith.addf %278, %281 : vector<8x16xf32>
    %283 = vector.extract_strided_slice %191 {offsets = [2, 1], sizes = [8, 16], strides = [1, 1]} : vector<12x20xf32> to vector<8x16xf32>
    %cst_88 = arith.constant 0.666666686 : f32
    %284 = vector.broadcast %cst_88 : f32 to vector<8x16xf32>
    %285 = arith.mulf %284, %283 : vector<8x16xf32>
    %286 = arith.addf %282, %285 : vector<8x16xf32>
    %287 = vector.extract_strided_slice %191 {offsets = [2, 2], sizes = [8, 16], strides = [1, 1]} : vector<12x20xf32> to vector<8x16xf32>
    %cst_89 = arith.constant -1.000000e+00 : f32
    %288 = vector.broadcast %cst_89 : f32 to vector<8x16xf32>
    %289 = arith.mulf %288, %287 : vector<8x16xf32>
    %290 = arith.addf %286, %289 : vector<8x16xf32>
    %291 = vector.extract_strided_slice %191 {offsets = [2, 3], sizes = [8, 16], strides = [1, 1]} : vector<12x20xf32> to vector<8x16xf32>
    %cst_90 = arith.constant 0.666666686 : f32
    %292 = vector.broadcast %cst_90 : f32 to vector<8x16xf32>
    %293 = arith.mulf %292, %291 : vector<8x16xf32>
    %294 = arith.addf %290, %293 : vector<8x16xf32>
    %295 = vector.extract_strided_slice %191 {offsets = [2, 4], sizes = [8, 16], strides = [1, 1]} : vector<12x20xf32> to vector<8x16xf32>
    %cst_91 = arith.constant -0.166666672 : f32
    %296 = vector.broadcast %cst_91 : f32 to vector<8x16xf32>
    %297 = arith.mulf %296, %295 : vector<8x16xf32>
    %298 = arith.addf %294, %297 : vector<8x16xf32>
    %299 = vector.extract_strided_slice %191 {offsets = [3, 0], sizes = [8, 16], strides = [1, 1]} : vector<12x20xf32> to vector<8x16xf32>
    %cst_92 = arith.constant 0.166666672 : f32
    %300 = vector.broadcast %cst_92 : f32 to vector<8x16xf32>
    %301 = arith.mulf %300, %299 : vector<8x16xf32>
    %302 = arith.addf %298, %301 : vector<8x16xf32>
    %303 = vector.extract_strided_slice %191 {offsets = [3, 1], sizes = [8, 16], strides = [1, 1]} : vector<12x20xf32> to vector<8x16xf32>
    %cst_93 = arith.constant -5.000000e-01 : f32
    %304 = vector.broadcast %cst_93 : f32 to vector<8x16xf32>
    %305 = arith.mulf %304, %303 : vector<8x16xf32>
    %306 = arith.addf %302, %305 : vector<8x16xf32>
    %307 = vector.extract_strided_slice %191 {offsets = [3, 2], sizes = [8, 16], strides = [1, 1]} : vector<12x20xf32> to vector<8x16xf32>
    %cst_94 = arith.constant 0.666666686 : f32
    %308 = vector.broadcast %cst_94 : f32 to vector<8x16xf32>
    %309 = arith.mulf %308, %307 : vector<8x16xf32>
    %310 = arith.addf %306, %309 : vector<8x16xf32>
    %311 = vector.extract_strided_slice %191 {offsets = [3, 3], sizes = [8, 16], strides = [1, 1]} : vector<12x20xf32> to vector<8x16xf32>
    %cst_95 = arith.constant -5.000000e-01 : f32
    %312 = vector.broadcast %cst_95 : f32 to vector<8x16xf32>
    %313 = arith.mulf %312, %311 : vector<8x16xf32>
    %314 = arith.addf %310, %313 : vector<8x16xf32>
    %315 = vector.extract_strided_slice %191 {offsets = [3, 4], sizes = [8, 16], strides = [1, 1]} : vector<12x20xf32> to vector<8x16xf32>
    %cst_96 = arith.constant 0.166666672 : f32
    %316 = vector.broadcast %cst_96 : f32 to vector<8x16xf32>
    %317 = arith.mulf %316, %315 : vector<8x16xf32>
    %318 = arith.addf %314, %317 : vector<8x16xf32>
    %319 = vector.extract_strided_slice %191 {offsets = [4, 0], sizes = [8, 16], strides = [1, 1]} : vector<12x20xf32> to vector<8x16xf32>
    %cst_97 = arith.constant -0.0833333358 : f32
    %320 = vector.broadcast %cst_97 : f32 to vector<8x16xf32>
    %321 = arith.mulf %320, %319 : vector<8x16xf32>
    %322 = arith.addf %318, %321 : vector<8x16xf32>
    %323 = vector.extract_strided_slice %191 {offsets = [4, 1], sizes = [8, 16], strides = [1, 1]} : vector<12x20xf32> to vector<8x16xf32>
    %cst_98 = arith.constant 0.166666672 : f32
    %324 = vector.broadcast %cst_98 : f32 to vector<8x16xf32>
    %325 = arith.mulf %324, %323 : vector<8x16xf32>
    %326 = arith.addf %322, %325 : vector<8x16xf32>
    %327 = vector.extract_strided_slice %191 {offsets = [4, 2], sizes = [8, 16], strides = [1, 1]} : vector<12x20xf32> to vector<8x16xf32>
    %cst_99 = arith.constant -0.166666672 : f32
    %328 = vector.broadcast %cst_99 : f32 to vector<8x16xf32>
    %329 = arith.mulf %328, %327 : vector<8x16xf32>
    %330 = arith.addf %326, %329 : vector<8x16xf32>
    %331 = vector.extract_strided_slice %191 {offsets = [4, 3], sizes = [8, 16], strides = [1, 1]} : vector<12x20xf32> to vector<8x16xf32>
    %cst_100 = arith.constant 0.166666672 : f32
    %332 = vector.broadcast %cst_100 : f32 to vector<8x16xf32>
    %333 = arith.mulf %332, %331 : vector<8x16xf32>
    %334 = arith.addf %330, %333 : vector<8x16xf32>
    %335 = vector.extract_strided_slice %191 {offsets = [4, 4], sizes = [8, 16], strides = [1, 1]} : vector<12x20xf32> to vector<8x16xf32>
    %cst_101 = arith.constant -0.0833333358 : f32
    %336 = vector.broadcast %cst_101 : f32 to vector<8x16xf32>
    %337 = arith.mulf %336, %335 : vector<8x16xf32>
    %338 = arith.addf %334, %337 : vector<8x16xf32>
    %cst_102 = arith.constant -3.000000e+00 : f32
    %cst_103 = arith.constant 3.000000e+00 : f32
    %339 = vector.broadcast %cst_102 : f32 to vector<8x16xf32>
    %340 = arith.maximumf %339, %338 : vector<8x16xf32>
    %341 = vector.broadcast %cst_103 : f32 to vector<8x16xf32>
    %342 = arith.minimumf %341, %340 : vector<8x16xf32>
    %c8_i32_104 = arith.constant 8 : i32
    %343 = arith.muli %c1_i32, %c8_i32_104 : i32
    %c0_105 = arith.constant 0 : index
    %c1_106 = arith.constant 1 : index
    %344 = arith.index_cast %343 : i32 to index
    %c0_107 = arith.constant 0 : index
    %345 = vector.load %arg3[%c0_105, %c1_106, %344, %c0_107] : memref<1x3x16x16xf32, #tpu.memory_space<vmem>>, vector<1x1x8x16xf32>
    %346 = vector.shape_cast %345 : vector<1x1x8x16xf32> to vector<8x16xf32>
    %347 = vector.shape_cast %342 : vector<8x16xf32> to vector<1x1x8x16xf32>
    tpu.vector_store %arg3[%c0_105, %c1_106, %344, %c0_107], %347 {strides = array<i32>} : memref<1x3x16x16xf32, #tpu.memory_space<vmem>>, vector<1x1x8x16xf32>,
    %cst_108 = arith.constant 0.000000e+00 : f32
    %348 = vector.broadcast %cst_108 : f32 to vector<8x16xf32>
    %349 = vector.extract_strided_slice %191 {offsets = [2, 1], sizes = [8, 16], strides = [1, 1]} : vector<12x20xf32> to vector<8x16xf32>
    %cst_109 = arith.constant 5.000000e-01 : f32
    %350 = vector.broadcast %cst_109 : f32 to vector<8x16xf32>
    %351 = arith.mulf %350, %349 : vector<8x16xf32>
    %352 = arith.addf %348, %351 : vector<8x16xf32>
    %353 = vector.extract_strided_slice %191 {offsets = [2, 2], sizes = [8, 16], strides = [1, 1]} : vector<12x20xf32> to vector<8x16xf32>
    %cst_110 = arith.constant -1.000000e+00 : f32
    %354 = vector.broadcast %cst_110 : f32 to vector<8x16xf32>
    %355 = arith.mulf %354, %353 : vector<8x16xf32>
    %356 = arith.addf %352, %355 : vector<8x16xf32>
    %357 = vector.extract_strided_slice %191 {offsets = [2, 3], sizes = [8, 16], strides = [1, 1]} : vector<12x20xf32> to vector<8x16xf32>
    %cst_111 = arith.constant 5.000000e-01 : f32
    %358 = vector.broadcast %cst_111 : f32 to vector<8x16xf32>
    %359 = arith.mulf %358, %357 : vector<8x16xf32>
    %360 = arith.addf %356, %359 : vector<8x16xf32>
    %cst_112 = arith.constant -3.000000e+00 : f32
    %cst_113 = arith.constant 3.000000e+00 : f32
    %361 = vector.broadcast %cst_112 : f32 to vector<8x16xf32>
    %362 = arith.maximumf %361, %360 : vector<8x16xf32>
    %363 = vector.broadcast %cst_113 : f32 to vector<8x16xf32>
    %364 = arith.minimumf %363, %362 : vector<8x16xf32>
    %c8_i32_114 = arith.constant 8 : i32
    %365 = arith.muli %c1_i32, %c8_i32_114 : i32
    %c0_115 = arith.constant 0 : index
    %c2_116 = arith.constant 2 : index
    %366 = arith.index_cast %365 : i32 to index
    %c0_117 = arith.constant 0 : index
    %367 = vector.load %arg3[%c0_115, %c2_116, %366, %c0_117] : memref<1x3x16x16xf32, #tpu.memory_space<vmem>>, vector<1x1x8x16xf32>
    %368 = vector.shape_cast %367 : vector<1x1x8x16xf32> to vector<8x16xf32>
    %369 = vector.shape_cast %364 : vector<8x16xf32> to vector<1x1x8x16xf32>
    tpu.vector_store %arg3[%c0_115, %c2_116, %366, %c0_117], %369 {strides = array<i32>} : memref<1x3x16x16xf32, #tpu.memory_space<vmem>>, vector<1x1x8x16xf32>,
    %c2_i32 = arith.constant 2 : i32
    return
  }
  func.func @transform_0(%arg0: i32, %arg1: i32) -> (i32, i32, i32) {
    %c0_i32 = arith.constant 0 : i32
    %c0_i32_0 = arith.constant 0 : i32
    %c0_i32_1 = arith.constant 0 : i32
    return %arg0, %c0_i32, %c0_i32_0 : i32, i32, i32
  }
  func.func @transform_1(%arg0: i32, %arg1: i32) -> (i32, i32, i32, i32) {
    %c0_i32 = arith.constant 0 : i32
    %c0_i32_0 = arith.constant 0 : i32
    %c0_i32_1 = arith.constant 0 : i32
    return %arg0, %c0_i32, %arg1, %c0_i32_0 : i32, i32, i32, i32
  }
}

</mosaic_0001>

<bundles_post_ra>
// kernel: srm_conv2d.1
= control target key start
LH: loop header
LB: loop body
LE: loop exit
PB: predicated region body
PF: predicated region fallthrough
CT: control target
= control target key end

     0   :  { %6 = vsyncpa [#allocation3], 0  ;;  %s1478_s0 = inlined_call_operand.vmem [shape: f32[2,20,20], index: 0, kind: input, shape index: {}]   ;;  %s1479_s1 = inlined_call_operand.hbm [shape: f32[2,3,16,16], index: 1, kind: output, shape index: {}]  }
   0x1   :  { %8 = vsyncpa [#allocation3 + $0x1], 0  ;;  %s983_s6 = smov 0   ;;  %s985_s7 = smov 0  }
   0x2   :  { %s987_s8 = smov 0   ;;  %s989_s9 = smov 0  }
   0x3   :  { %s991_s10 = smov 0   ;;  %s993_s11 = smov 0  }
   0x4 LB: > { %s795_s12 = sadd.s32 4294967295, %s964_s11   ;;  %s796_s13 = sadd.s32 4294967294, %s964_s11   ;;  %s964_s11 = sphi %s993_s11, %s14_s11   ;;  %s960_s10 = sphi %s991_s10, %s1486_s10   ;;  %s956_s9 = sphi %s989_s9, %s1485_s9   ;;  %s952_s8 = sphi %s987_s8, %s1484_s8   ;;  %s948_s7 = sphi %s985_s7, %s1483_s7   ;;  %s944_s6 = sphi %s983_s6, %s1482_s6  }
   0x5   : > { %s26_s14 = sadd.s32 1, %s960_s10  ;;  %s61_s15 = sadd.s32 1, %s952_s8 }
   0x6   : > { %p28_p0 = scmp.ge.s32.totalorder %s26_s14, 2  ;;  %p71_p1 = scmp.ne.s32.totalorder %s952_s8, %s948_s7 }
   0x7   : > { %p72_p2 = scmp.eq.s32.totalorder %s795_s12, 1  ;;  %p77_p3 = scmp.ne.s32.totalorder %s948_s7, %s944_s6 }
   0x8   : > { %s1488_s14 = smov (%p28_p0, %s26_s14), 0  ;;  %p78_p5 = scmp.eq.s32.totalorder %s796_s13, 1 }
   0x9   : > { %p1023_p4 = por %p72_p2, %p71_p1  ;;  %s56_s17 = ssub.s32 %s960_s10, %s1488_s14 }
   0xa   : > { %p799_p6 = scmp.ge.s32.totalorder %s964_s11, 1  ;;  %p59_p7 = scmp.eq.s32.totalorder %s56_s17, 0 }
   0xb   : > { %p1030_p8 = por %p78_p5, %p77_p3  ;;  %p104_p9 = scmp.lt.s32.totalorder %s964_s11, 3 }
   0xc   : > { %s1036_s19 = scalar_select %p59_p7, %s952_s8, %s61_s15  }
   0xd   : > { %p105_p10 = pnand %p799_p6, %p104_p9 }
   0xe   : > { %p124_p11 = scmp.lt.s32.totalorder (!%p105_p10), %s956_s9, 1  ;;  %s966_s25 = smov (!%p105_p10), 127   ;;  %vm160_vm0 = vcmask (!%p105_p10), 1046528   ;;  %vm191_vm1 = vcmask (!%p105_p10), 1045504   ;;  %vm323_vm2 = vcmask (!%p105_p10), 1044480   ;;  %vm353_vm3 = vcmask (!%p105_p10), 1043456  }
   0xf   : > { %108 = sbr.rel (%p105_p10) target bundleno = 340 (0x154), region = 24  ;;  %s967_s26 = smov (!%p105_p10), 126   ;;  %vm230_vm4 = vcmask (!%p105_p10), 130049   ;;  %vm384_vm5 = vcmask (!%p105_p10), 130048   ;;  %vm232_vm6 = vcmask (!%p105_p10), 122880   ;;  %vm419_vm7 = vcmask (!%p105_p10), 123904  }
  0x10   : > { %s968_s27 = smov (!%p105_p10), 125   ;;  %s969_s28 = smov (!%p105_p10), 124   ;;  %vm417_vm8 = vcmask (!%p105_p10), 130050  }
  0x11   : > { %s121_s29 = sand.u32 (!%p105_p10), 1, %s948_s7   ;;  %s824_s3 = smul.u32 (!%p105_p10), 768, %s956_s9 }
  0x12   : > { %s822_s30 = smul.u32 (!%p105_p10), 48, %s121_s29  ;;  %s970_s17 = smov (!%p105_p10), [#allocation2]  }
  0x13   : > { %s1424_s13 = scalar_lea.hbm (!%p105_p10), %s1479_s1, %s824_s3 }
  0x14   : > { %s123_s2 = scalar_lea.vmem (!%p105_p10), [#allocation2], %s822_s30 }
  0x15   : > { %s717_s4 = sshll.u32 (!%p105_p10), %s123_s2, 4  ;;  %s1426_s4 = int_to_ptr.vmem [resolvable:$true] %s717_s4 }
  0x16   : > { %s125_s20 = scalar_select %p124_p11, %s956_s9, 1 }
  0x17   : > { %s1432_s9 = scalar_lea.sflag [#allocation3], %s121_s29  ;;  %s886_s15 = scalar_lea.vmem %s1426_s4, 768 }
  0x18   : > { %s823_s21 = smul.u32 24, %s125_s20  ;;  %p887_p12 = scmp.ne.s32.totalorder %s1426_s4, %s886_s15 }
  0x19   : > { %s890_s20 = sshll.u32 %s970_s17, 4  ;;  %s891_s20 = int_to_ptr.vmem [resolvable:$false] %s890_s20 }
  0x1a   : > { %s1043_s24 = scalar_lea.vmem %s1478_s0, %s823_s21  ;;  %p888_p13 = pnand %p887_p12, %p1023_p4 }
  0x1b   : > { %v1046_v0 = vld [vmem:[%s1043_s24] sm:$0xff]  ;;  %v1049_v1 = vld [vmem:[%s1043_s24 + $0x8] sm:$0xf]  ;;  %v1112_v29 = vld [vmem:[%s1043_s24 + $0x10] sm:$0xf]  ;;  %s892_s21 = scalar_lea.vmem %s891_s20, 1536  ;;  %p893_p1 = scmp.lt.s32.totalorder %s1426_s4, %s891_s20 }
  0x1c   : > { %v1052_v2 = vmul.f32 0.5, %v1046_v0  ;;  %v1055_v3 = vmul.f32 -0.25, %v1046_v0  ;;  %v1058_v4 = vmul.f32 -1.0, %v1046_v0  ;;  %v1061_v5 = vmul.f32 -1.0, %v1049_v1  ;;  %v1101_v24 = vld [vmem:[%s1043_s24 + $0x8] sm:$0xff]  ;;  %p889_p0 = pneg %p888_p13  ;;  %p894_p2 = scmp.lt.s32.totalorder %s892_s21, %s886_s15 }
  0x1d   : > { %v1068_v6 = vmul.f32 0.5, %v1049_v1  ;;  %v1071_v7 = vmul.f32 -0.25, %v1049_v1  ;;  %v264_v16 = vmul.f32 -0.5, %v1046_v0  ;;  %v265_v17 = vmul.f32 -0.5, %v1049_v1 }
  0x1e   : > { %142 = vrot.lane.b32.xlu0 %v1052_v2, %s966_s25  ;;  %152 = vrot.lane.b32.xlu1 %v1055_v3, %s967_s26  ;;  %v172_v8 = vrot.slane %v1058_v4, 1  ;;  %v173_v9 = vrot.slane %v1061_v5, 1  ;;  %v161_v11 = vrot.slane %v1052_v2, 1  ;;  %v199_v13 = vrot.slane %v1052_v2, 2  ;;  %p895_p3 = por %p894_p2, %p893_p1 }
  0x1f   : > { %v1082_v12 = vrot.slane %v1068_v6, 1  ;;  %v200_v14 = vrot.slane %v1068_v6, 2  ;;  %v1089_v15 = vrot.slane %v1071_v7, 2  ;;  %v192_v19 = vrot.slane %v1055_v3, 2 }
  0x20   : > { %v174_v10 = vsel %vm160_vm0, %v172_v8, %v173_v9  ;;  %v275_v20 = vmul.f32 0.6666667, %v1046_v0  ;;  %v276_v21 = vmul.f32 0.6666667, %v1049_v1  ;;  %v268_v22 = vrot.slane %v264_v16, 1  ;;  %p896_p5 = pnand %p895_p3, %p889_p0 }
  0x21   : > { %v1095_v18 = vsel %vm160_vm0, %v161_v11, %v1082_v12  ;;  %v269_v23 = vrot.slane %v265_v17, 1  ;;  %v1104_v25 = vmul.f32 0.16666667, %v1046_v0  ;;  %v201_v28 = vsel %vm191_vm1, %v199_v13, %v200_v14 }
  0x22   : > { %144 = vrot.lane.b32.xlu0 %v1068_v6, %s966_s25  ;;  %154 = vrot.lane.b32.xlu1 %v1071_v7, %s967_s26  ;;  %v279_v26 = vrot.slane %v275_v20, 1  ;;  %v280_v27 = vrot.slane %v276_v21, 1  ;;  %v1115_v30 = vmul.f32 0.16666667, %v1101_v24  ;;  %v257_v32 = vmul.f32 0.16666667, %v1049_v1 }
  0x23   : > { %v1118_v31 = vsel %vm160_vm0, %v268_v22, %v269_v23  ;;  %v1123_v33 = vsel %vm191_vm1, %v192_v19, %v1089_v15  ;;  %v259_v35 = vrot.slane %v1104_v25, 1  ;;  %v1130_v36 = vmul.f32 0.16666667, %v1112_v29 }
  0x24   : > { %v1126_v34 = vsel %vm160_vm0, %v279_v26, %v280_v27  ;;  %v1133_v37 = vmul.f32 -1.0, %v1101_v24  ;;  %v260_v38 = vrot.slane %v257_v32, 1  ;;  %v546_v39 = vrot.slane %v1115_v30, 1 }
  0x25   : > { %v301_v40 = vrot.slane %v275_v20, 2  ;;  %v1137_v41 = vmul.f32 -1.0, %v1112_v29  ;;  %v1140_v42 = vmul.f32 -0.16666667, %v1046_v0  ;;  %v547_v43 = vrot.slane %v1130_v36, 1 }
  0x26   : > { %175 = vrot.lane.b32.xlu0 %v174_v10, %s966_s25  ;;  %177 = vrot.lane.b32.xlu1 %v173_v9, %s966_s25  ;;  %v302_v44 = vrot.slane %v276_v21, 2  ;;  %v1146_v45 = vsel %vm160_vm0, %v259_v35, %v260_v38  ;;  %v308_v46 = vrot.slane %v1058_v4, 2  ;;  %v309_v47 = vrot.slane %v1061_v5, 2 }
  0x27   : > { %v595_v48 = vrot.slane %v1133_v37, 2  ;;  %v1152_v49 = vmul.f32 -0.16666667, %v1101_v24  ;;  %v1155_v50 = vsel %vm160_vm0, %v546_v39, %v547_v43  ;;  %v596_v52 = vrot.slane %v1137_v41, 2 }
  0x28   : > { %v1158_v51 = vsel %vm191_vm1, %v301_v40, %v302_v44  ;;  %v1162_v53 = vsel %vm191_vm1, %v308_v46, %v309_v47  ;;  %v294_v54 = vmul.f32 -0.16666667, %v1049_v1  ;;  %v296_v55 = vrot.slane %v1140_v42, 2 }
  0x29   : > { %v1167_v56 = vmul.f32 -0.16666667, %v1112_v29  ;;  %v1170_v57 = vsel %vm191_vm1, %v595_v48, %v596_v52  ;;  %v583_v58 = vrot.slane %v1152_v49, 2  ;;  %v329_v59 = vrot.slane %v264_v16, 3 }
  0x2a   : > { %183 = vrot.lane.b32.xlu0 %v1095_v18, %s967_s26  ;;  %185 = vrot.lane.b32.xlu1 %v1082_v12, %s967_s26  ;;  %v330_v60 = vrot.slane %v265_v17, 3  ;;  %v1178_v61 = vmul.f32 0.5, %v1101_v24  ;;  %v1181_v62 = vmul.f32 0.5, %v1112_v29  ;;  %v297_v63 = vrot.slane %v294_v54, 2 }
  0x2b   : > { %v584_v8 = vrot.slane %v1167_v56, 2  ;;  %v336_v10 = vrot.slane %v275_v20, 3  ;;  %v337_v11 = vrot.slane %v276_v21, 3  ;;  %v324_v17 = vrot.slane %v1104_v25, 3 }
  0x2c   : > { %v1185_v9 = vsel %vm323_vm2, %v329_v59, %v330_v60  ;;  %v1188_v13 = vsel %vm191_vm1, %v296_v55, %v297_v63  ;;  %v325_v19 = vrot.slane %v257_v32, 3  ;;  %v1202_v20 = vmul.f32 -0.25, %v1101_v24 }
  0x2d   : > { %v1194_v16 = vsel %vm323_vm2, %v336_v10, %v337_v11  ;;  %v1205_v21 = vmul.f32 -0.25, %v1112_v29  ;;  %v359_v22 = vrot.slane %v1104_v25, 4  ;;  %v462_v23 = vrot.slane %v1133_v37, 1 }
  0x2e   : > { %202 = vrot.lane.b32.xlu0 %v201_v28, %s966_s25  ;;  %204 = vrot.lane.b32.xlu1 %v200_v14, %s966_s25  ;;  %v1191_v14 = vsel %vm191_vm1, %v583_v58, %v584_v8  ;;  %v463_v26 = vrot.slane %v1137_v41, 1  ;;  %v1211_v27 = vsel %vm323_vm2, %v324_v17, %v325_v19  ;;  %v360_v28 = vrot.slane %v257_v32, 4 }
  0x2f   : > { %v366_v35 = vrot.slane %v1140_v42, 4  ;;  %v367_v38 = vrot.slane %v294_v54, 4  ;;  %v451_v44 = vrot.slane %v1178_v61, 1  ;;  %v1227_v32 = vrot.slane %v1181_v62, 1 }
  0x30   : > { %v1215_v39 = vsel %vm353_vm3, %v359_v22, %v360_v28  ;;  %v464_v43 = vsel %vm160_vm0, %v462_v23, %v463_v26  ;;  %v488_v47 = vrot.slane %v1178_v61, 2  ;;  %v489_v48 = vrot.slane %v1181_v62, 2 }
  0x31   : > { %v1222_v40 = vsel %vm353_vm3, %v366_v35, %v367_v38  ;;  %v1233_v46 = vsel %vm160_vm0, %v451_v44, %v1227_v32  ;;  %v481_v54 = vrot.slane %v1202_v20, 2  ;;  %v1254_v55 = vrot.slane %v1205_v21, 2 }
  0x32   : > { %212 = vrot.lane.b32.xlu1 %v1089_v15, %s967_s26  ;;  %210 = vrot.lane.b32.xlu0 %v1123_v33, %s967_s26  ;;  %v490_v52 = vsel %vm191_vm1, %v488_v47, %v489_v48  ;;  %v1290_v58 = vmul.f32 -0.083333336, %v1101_v24  ;;  %v562_v60 = vmul.f32 0.6666667, %v1101_v24  ;;  %v563_v63 = vmul.f32 0.6666667, %v1112_v29 }
  0x33   : > { %v610_v28 = vrot.slane %v1115_v30, 3  ;;  %v611_v35 = vrot.slane %v1130_v36, 3 }
  0x34   : > { %v567_v8 = vrot.slane %v563_v63, 1  ;;  %v588_v10 = vrot.slane %v562_v60, 2  ;;  %v589_v11 = vrot.slane %v563_v63, 2  ;;  %v622_v22 = vrot.slane %v562_v60, 3 }
  0x36   : > { %433 = vrot.lane.b32.xlu1 %v1178_v61, %s966_s25  ;;  %435 = vrot.lane.b32.xlu0 %v1181_v62, %s966_s25  ;;  %v590_v17 = vsel %vm191_vm1, %v588_v10, %v589_v11 }
  0x3a   : > { %443 = vrot.lane.b32.xlu1 %v1202_v20, %s967_s26  ;;  %445 = vrot.lane.b32.xlu0 %v1205_v21, %s967_s26 }
  0x3e   : > { %465 = vrot.lane.b32.xlu1 %v464_v43, %s966_s25  ;;  %467 = vrot.lane.b32.xlu0 %v463_v26, %s966_s25 }
  0x42   : > { %473 = vrot.lane.b32.xlu1 %v1233_v46, %s967_s26  ;;  %475 = vrot.lane.b32.xlu0 %v1227_v32, %s967_s26 }
  0x46   : > { %388 = vrot.lane.b32.xlu1 %v1058_v4, %s966_s25  ;;  %390 = vrot.lane.b32.xlu0 %v1061_v5, %s966_s25  ;;  %v1262_v4 = vsel %vm191_vm1, %v481_v54, %v1254_v55  ;;  %v551_v5 = vmul.f32 -0.5, %v1101_v24 }
  0x4a   : > { %491 = vrot.lane.b32.xlu1 %v490_v52, %s966_s25  ;;  %493 = vrot.lane.b32.xlu0 %v489_v48, %s966_s25  ;;  %v1344_v48 = vsel %vm323_vm2, %v610_v28, %v611_v35  ;;  %v645_v52 = vrot.slane %v1130_v36, 4  ;;  %v652_v36 = vrot.slane %v1167_v56, 4 }
  0x4e   : > { %671 = vrot.lane.b32.xlu1 %v1133_v37, %s966_s25  ;;  %673 = vrot.lane.b32.xlu0 %v1137_v41, %s966_s25  ;;  %v552_v37 = vmul.f32 -0.5, %v1112_v29  ;;  %v1287_v41 = vmul.f32 -0.083333336, %v1046_v0  ;;  %v566_v0 = vrot.slane %v562_v60, 1 }
  0x50   : > { %v556_v59 = vrot.slane %v552_v37, 1  ;;  %v568_v24 = vsel %vm160_vm0, %v566_v0, %v567_v8  ;;  %v354_v11 = vrot.slane %v1287_v41, 4 }
  0x52   : > { %396 = vrot.lane.b32.xlu1 %v1052_v2, %s967_s26  ;;  %398 = vrot.lane.b32.xlu0 %v1068_v6, %s967_s26 }
  0x56   : > { %499 = vrot.lane.b32.xlu1 %v1262_v4, %s967_s26  ;;  %501 = vrot.lane.b32.xlu0 %v1254_v55, %s967_s26 }
  0x5a   : > { %679 = vrot.lane.b32.xlu1 %v1178_v61, %s967_s26  ;;  %681 = vrot.lane.b32.xlu0 %v1181_v62, %s967_s26 }
  0x5e   : > { %238 = vrot.lane.b32.xlu1 %v1104_v25, %s966_s25  ;;  %525 = vrot.lane.b32.xlu0 %v1115_v30, %s966_s25 }
  0x62   : > { %244 = vrot.lane.b32.xlu1 %v1140_v42, %s967_s26  ;;  %531 = vrot.lane.b32.xlu0 %v1152_v49, %s967_s26  ;;  %v555_v42 = vrot.slane %v551_v5, 1 }
  0x66   : > { %248 = vrot.lane.b32.xlu1 %v1104_v25, %s968_s27  ;;  %535 = vrot.lane.b32.xlu0 %v1115_v30, %s968_s27  ;;  %v557_v25 = vsel %vm160_vm0, %v555_v42, %v556_v59 }
  0x6a   : > { %253 = vrot.lane.b32.xlu1 %v1287_v41, %s969_s28  ;;  %540 = vrot.lane.b32.xlu0 %v1290_v58, %s969_s28 }
  0x6e   : > { %271 = vrot.lane.b32.xlu1 %v1118_v31, %s966_s25  ;;  %558 = vrot.lane.b32.xlu0 %v557_v25, %s966_s25 }
  0x72   : > { %282 = vrot.lane.b32.xlu1 %v1126_v34, %s967_s26  ;;  %569 = vrot.lane.b32.xlu0 %v568_v24, %s967_s26  ;;  %v616_v34 = vrot.slane %v552_v37, 3 }
  0x76   : > { %286 = vrot.lane.b32.xlu1 %v1118_v31, %s968_s27  ;;  %573 = vrot.lane.b32.xlu0 %v557_v25, %s968_s27  ;;  %v615_v31 = vrot.slane %v551_v5, 3 }
  0x78   : > { %v617_v19 = vsel %vm323_vm2, %v615_v31, %v616_v34  ;;  %v637_v31 = vmul.f32 -0.083333336, %v1112_v29 }
  0x7a   : > { %290 = vrot.lane.b32.xlu1 %v1146_v45, %s969_s28  ;;  %577 = vrot.lane.b32.xlu0 %v1155_v50, %s969_s28 }
  0x7e   : > { %304 = vrot.lane.b32.xlu1 %v1158_v51, %s966_s25  ;;  %591 = vrot.lane.b32.xlu0 %v590_v17, %s966_s25 }
  0x82   : > { %311 = vrot.lane.b32.xlu1 %v1162_v53, %s967_s26  ;;  %598 = vrot.lane.b32.xlu0 %v1170_v57, %s967_s26  ;;  %v623_v53 = vrot.slane %v563_v63, 3 }
  0x86   : > { %315 = vrot.lane.b32.xlu1 %v1158_v51, %s968_s27  ;;  %602 = vrot.lane.b32.xlu0 %v590_v17, %s968_s27  ;;  %v624_v51 = vsel %vm323_vm2, %v622_v22, %v623_v53  ;;  %v640_v53 = vrot.slane %v637_v31, 4 }
  0x8a   : > { %319 = vrot.lane.b32.xlu1 %v1188_v13, %s969_s28  ;;  %606 = vrot.lane.b32.xlu0 %v1191_v14, %s969_s28 }
  0x8e   : > { %332 = vrot.lane.b32.xlu1 %v1185_v9, %s966_s25  ;;  %618 = vrot.lane.b32.xlu0 %v617_v19, %s966_s25 }
  0x90   : > { %v143_v57 = vpop.permute.xlu0 %142  ;;  %v153_v23 = vpop.permute.xlu1 %152 }
  0x91   : > { %v148_v26 = vadd.f32 %v143_v57, %v1055_v3 }
  0x92   : > { %339 = vrot.lane.b32.xlu1 %v1194_v16, %s967_s26  ;;  %625 = vrot.lane.b32.xlu0 %v624_v51, %s967_s26  ;;  %v644_v16 = vrot.slane %v1115_v30, 4 }
  0x93   : > { %v158_v44 = vadd.f32 %v153_v23, %v148_v26 }
  0x94   : > { %v145_v38 = vpop.permute.xlu0 %144  ;;  %v155_v43 = vpop.permute.xlu1 %154  ;;  %v646_v30 = vsel %vm353_vm3, %v644_v16, %v645_v52 }
  0x95   : > { %v149_v47 = vadd.f32 %v145_v38, %v1071_v7  ;;  %v166_v37 = vadd.f32 %v1095_v18, %v158_v44  ;;  %v651_v7 = vrot.slane %v1152_v49, 4  ;;  %v351_v49 = vmul.f32 -0.083333336, %v1049_v1 }
  0x96   : > { %343 = vrot.lane.b32.xlu1 %v1185_v9, %s968_s27  ;;  %629 = vrot.lane.b32.xlu0 %v617_v19, %s968_s27 }
  0x97   : > { %v159_v3 = vadd.f32 %v155_v43, %v149_v47  ;;  %v653_v0 = vsel %vm353_vm3, %v651_v7, %v652_v36  ;;  %v355_v17 = vrot.slane %v351_v49, 4 }
  0x98   : > { %v176_v54 = vpop.permute.xlu0 %175  ;;  %v178_v5 = vpop.permute.xlu1 %177 }
  0x99   : > { %v167_v42 = vadd.f32 %v1082_v12, %v159_v3  ;;  %v181_v9 = vadd.f32 %v176_v54, %v166_v37 }
  0x9a   : > { %347 = vrot.lane.b32.xlu1 %v1211_v27, %s969_s28  ;;  %633 = vrot.lane.b32.xlu0 %v1344_v48, %s969_s28 }
  0x9b   : > { %v182_v59 = vadd.f32 %v178_v5, %v167_v42 }
  0x9c   : > { %v184_v60 = vpop.permute.xlu0 %183  ;;  %v186_v63 = vpop.permute.xlu1 %185 }
  0x9d   : > { %v189_v25 = vadd.f32 %v184_v60, %v181_v9  ;;  %v190_v18 = vadd.f32 %v186_v63, %v182_v59 }
  0x9e   : > { %362 = vrot.lane.b32.xlu1 %v1215_v39, %s966_s25  ;;  %647 = vrot.lane.b32.xlu0 %v646_v30, %s966_s25 }
  0x9f   : > { %v197_v12 = vadd.f32 %v1123_v33, %v189_v25  ;;  %v198_v10 = vadd.f32 %v1089_v15, %v190_v18  ;;  %v1373_v15 = vsel %vm353_vm3, %v354_v11, %v355_v17 }
  0xa0   : > { %v203_v8 = vpop.permute.xlu0 %202  ;;  %v205_v24 = vpop.permute.xlu1 %204 }
  0xa1   : > { %v208_v56 = vadd.f32 %v203_v8, %v197_v12  ;;  %v209_v22 = vadd.f32 %v205_v24, %v198_v10 }
  0xa2   : > { %369 = vrot.lane.b32.xlu1 %v1222_v40, %s967_s26  ;;  %654 = vrot.lane.b32.xlu0 %v653_v0, %s967_s26  ;;  %v639_v40 = vrot.slane %v1290_v58, 4 }
  0xa4   : > { %v213_v33 = vpop.permute.xlu1 %212  ;;  %v211_v34 = vpop.permute.xlu0 %210  ;;  %v1380_v29 = vsel %vm353_vm3, %v639_v40, %v640_v53 }
  0xa5   : > { %v216_v19 = vadd.f32 %v211_v34, %v208_v56  ;;  %v217_v51 = vadd.f32 %v213_v33, %v209_v22 }
  0xa6   : > { %373 = vrot.lane.b32.xlu1 %v1215_v39, %s968_s27  ;;  %658 = vrot.lane.b32.xlu0 %v646_v30, %s968_s27 }
  0xa7   : > { %v801_v1 = vclamps-f32 %v216_v19, 3.0  ;;  %v802_v39 = vclamps-f32 %v217_v51, 3.0 }
  0xa8   : > { %v434_v57 = vpop.permute.xlu1 %433  ;;  %v436_v23 = vpop.permute.xlu0 %435 }
  0xa9   : > { %v439_v47 = vadd.f32 %v434_v57, %v1202_v20  ;;  %v440_v3 = vadd.f32 %v436_v23, %v1205_v21 }
  0xaa   : > { %377 = vrot.lane.b32.xlu1 %v1373_v15, %s969_s28  ;;  %224 = vrot.lane.b32.xlu0 %v801_v1, %s966_s25 }
  0xac   : > { %v444_v26 = vpop.permute.xlu1 %443  ;;  %v446_v28 = vpop.permute.xlu0 %445 }
  0xad   : > { %v449_v16 = vadd.f32 %v444_v26, %v439_v47  ;;  %v450_v52 = vadd.f32 %v446_v28, %v440_v3 }
  0xae   : > { %226 = vrot.lane.b32.xlu1 %v802_v39, %s966_s25  ;;  %662 = vrot.lane.b32.xlu0 %v1380_v29, %s969_s28 }
  0xaf   : > { %v456_v37 = vadd.f32 %v1233_v46, %v449_v16  ;;  %v457_v42 = vadd.f32 %v1227_v32, %v450_v52 }
  0xb0   : > { %v466_v35 = vpop.permute.xlu1 %465  ;;  %v468_v38 = vpop.permute.xlu0 %467 }
  0xb1   : > { %v471_v59 = vadd.f32 %v466_v35, %v456_v37  ;;  %v472_v30 = vadd.f32 %v468_v38, %v457_v42 }
  0xb4   : > { %v474_v43 = vpop.permute.xlu1 %473  ;;  %v476_v44 = vpop.permute.xlu0 %475 }
  0xb5   : > { %v479_v63 = vadd.f32 %v474_v43, %v471_v59  ;;  %v480_v25 = vadd.f32 %v476_v44, %v472_v30 }
  0xb7   : > { %v486_v0 = vadd.f32 %v1262_v4, %v479_v63  ;;  %v487_v46 = vadd.f32 %v1254_v55, %v480_v25 }
  0xb8   : > { %v389_v54 = vpop.permute.xlu1 %388  ;;  %v391_v5 = vpop.permute.xlu0 %390 }
  0xb9   : > { %v394_v20 = vadd.f32 %v389_v54, %v1052_v2  ;;  %v395_v21 = vadd.f32 %v391_v5, %v1068_v6 }
  0xbc   : > { %v492_v7 = vpop.permute.xlu1 %491  ;;  %v494_v9 = vpop.permute.xlu0 %493 }
  0xbd   : > { %v497_v8 = vadd.f32 %v492_v7, %v486_v0  ;;  %v498_v24 = vadd.f32 %v494_v9, %v487_v46 }
  0xc0   : > { %v672_v36 = vpop.permute.xlu1 %671  ;;  %v674_v60 = vpop.permute.xlu0 %673 }
  0xc1   : > { %v677_v2 = vadd.f32 %v672_v36, %v1178_v61  ;;  %v678_v6 = vadd.f32 %v674_v60, %v1181_v62 }
  0xc4   : > { %v397_v18 = vpop.permute.xlu1 %396  ;;  %v399_v12 = vpop.permute.xlu0 %398 }
  0xc5   : > { %v402_v49 = vadd.f32 %v397_v18, %v394_v20  ;;  %v403_v32 = vadd.f32 %v399_v12, %v395_v21 }
  0xc7   : > { %v805_v10 = vclamps-f32 %v402_v49, 3.0  ;;  %v806_v56 = vclamps-f32 %v403_v32, 3.0 }
  0xc8   : > { %v500_v11 = vpop.permute.xlu1 %499  ;;  %v502_v17 = vpop.permute.xlu0 %501 }
  0xc9   : > { %v505_v31 = vadd.f32 %v500_v11, %v497_v8  ;;  %v506_v33 = vadd.f32 %v502_v17, %v498_v24  ;;  %412 = vrot.lane.b32.xlu1 %v806_v56, %s966_s25  ;;  %410 = vrot.lane.b32.xlu0 %v805_v10, %s966_s25 }
  0xcb   : > { %v811_v4 = vclamps-f32 %v505_v31, 3.0  ;;  %v812_v55 = vclamps-f32 %v506_v33, 3.0 }
  0xcc   : > { %v680_v34 = vpop.permute.xlu1 %679  ;;  %v682_v19 = vpop.permute.xlu0 %681 }
  0xcd   : > { %v685_v22 = vadd.f32 %v680_v34, %v677_v2  ;;  %v686_v1 = vadd.f32 %v682_v19, %v678_v6  ;;  %515 = vrot.lane.b32.xlu1 %v812_v55, %s966_s25  ;;  %513 = vrot.lane.b32.xlu0 %v811_v4, %s966_s25 }
  0xcf   : > { %v815_v40 = vclamps-f32 %v685_v22, 3.0  ;;  %v816_v53 = vclamps-f32 %v686_v1, 3.0 }
  0xd0   : > { %v239_v51 = vpop.permute.xlu1 %238  ;;  %v526_v57 = vpop.permute.xlu0 %525 }
  0xd1   : > { %v241_v23 = vadd.f32 %v239_v51, %v1287_v41  ;;  %v528_v61 = vadd.f32 %v526_v57, %v1290_v58  ;;  %695 = vrot.lane.b32.xlu1 %v816_v53, %s966_s25  ;;  %693 = vrot.lane.b32.xlu0 %v815_v40, %s966_s25 }
  0xd4   : > { %v245_v62 = vpop.permute.xlu1 %244  ;;  %v532_v39 = vpop.permute.xlu0 %531 }
  0xd5   : > { %v247_v26 = vadd.f32 %v245_v62, %v241_v23  ;;  %v534_v28 = vadd.f32 %v532_v39, %v528_v61 }
  0xd8   : > { %v249_v35 = vpop.permute.xlu1 %248  ;;  %v536_v38 = vpop.permute.xlu0 %535 }
  0xd9   : > { %v251_v43 = vadd.f32 %v249_v35, %v247_v26  ;;  %v538_v44 = vadd.f32 %v536_v38, %v534_v28 }
  0xdc   : > { %v254_v47 = vpop.permute.xlu1 %253  ;;  %v541_v3 = vpop.permute.xlu0 %540 }
  0xdd   : > { %v256_v16 = vadd.f32 %v254_v47, %v251_v43  ;;  %v543_v52 = vadd.f32 %v541_v3, %v538_v44 }
  0xdf   : > { %v263_v41 = vadd.f32 %v1146_v45, %v256_v16  ;;  %v550_v58 = vadd.f32 %v1155_v50, %v543_v52 }
  0xe0   : > { %v272_v54 = vpop.permute.xlu1 %271  ;;  %v559_v5 = vpop.permute.xlu0 %558 }
  0xe1   : > { %v274_v37 = vadd.f32 %v272_v54, %v263_v41  ;;  %v561_v42 = vadd.f32 %v559_v5, %v550_v58 }
  0xe4   : > { %v283_v7 = vpop.permute.xlu1 %282  ;;  %v570_v9 = vpop.permute.xlu0 %569 }
  0xe5   : > { %v285_v59 = vadd.f32 %v283_v7, %v274_v37  ;;  %v572_v30 = vadd.f32 %v570_v9, %v561_v42 }
  0xe8   : > { %v287_v36 = vpop.permute.xlu1 %286  ;;  %v574_v60 = vpop.permute.xlu0 %573 }
  0xe9   : > { %v289_v63 = vadd.f32 %v287_v36, %v285_v59  ;;  %v576_v25 = vadd.f32 %v574_v60, %v572_v30 }
  0xec   : > { %v291_v20 = vpop.permute.xlu1 %290  ;;  %v578_v21 = vpop.permute.xlu0 %577 }
  0xed   : > { %v293_v18 = vadd.f32 %v291_v20, %v289_v63  ;;  %v580_v12 = vadd.f32 %v578_v21, %v576_v25 }
  0xef   : > { %v300_v45 = vadd.f32 %v1188_v13, %v293_v18  ;;  %v587_v50 = vadd.f32 %v1191_v14, %v580_v12 }
  0xf0   : > { %v305_v0 = vpop.permute.xlu1 %304  ;;  %v592_v46 = vpop.permute.xlu0 %591 }
  0xf1   : > { %v307_v49 = vadd.f32 %v305_v0, %v300_v45  ;;  %v594_v32 = vadd.f32 %v592_v46, %v587_v50 }
  0xf4   : > { %v312_v8 = vpop.permute.xlu1 %311  ;;  %v599_v24 = vpop.permute.xlu0 %598 }
  0xf5   : > { %v314_v10 = vadd.f32 %v312_v8, %v307_v49  ;;  %v601_v56 = vadd.f32 %v599_v24, %v594_v32 }
  0xf8   : > { %v316_v11 = vpop.permute.xlu1 %315  ;;  %v603_v17 = vpop.permute.xlu0 %602 }
  0xf9   : > { %v318_v31 = vadd.f32 %v316_v11, %v314_v10  ;;  %v605_v33 = vadd.f32 %v603_v17, %v601_v56 }
  0xfc   : > { %v320_v2 = vpop.permute.xlu1 %319  ;;  %v607_v6 = vpop.permute.xlu0 %606 }
  0xfd   : > { %v322_v4 = vadd.f32 %v320_v2, %v318_v31  ;;  %v609_v55 = vadd.f32 %v607_v6, %v605_v33 }
  0xff   : > { %v328_v13 = vadd.f32 %v1211_v27, %v322_v4  ;;  %v614_v22 = vadd.f32 %v1344_v48, %v609_v55 }
 0x100   : > { %v333_v34 = vpop.permute.xlu1 %332  ;;  %v619_v14 = vpop.permute.xlu0 %618 }
 0x101   : > { %v335_v19 = vadd.f32 %v333_v34, %v328_v13  ;;  %v621_v53 = vadd.f32 %v619_v14, %v614_v22 }
 0x104   : > { %v340_v1 = vpop.permute.xlu1 %339  ;;  %v626_v40 = vpop.permute.xlu0 %625 }
 0x105   : > { %v342_v51 = vadd.f32 %v340_v1, %v335_v19  ;;  %v628_v61 = vadd.f32 %v626_v40, %v621_v53 }
 0x108   : > { %v344_v57 = vpop.permute.xlu1 %343  ;;  %v630_v23 = vpop.permute.xlu0 %629 }
 0x109   : > { %v346_v62 = vadd.f32 %v344_v57, %v342_v51  ;;  %v632_v28 = vadd.f32 %v630_v23, %v628_v61 }
 0x10c   : > { %v348_v39 = vpop.permute.xlu1 %347  ;;  %v634_v26 = vpop.permute.xlu0 %633 }
 0x10d   : > { %v350_v35 = vadd.f32 %v348_v39, %v346_v62  ;;  %v636_v43 = vadd.f32 %v634_v26, %v632_v28 }
 0x10f   : > { %v358_v44 = vadd.f32 %v1373_v15, %v350_v35  ;;  %v643_v16 = vadd.f32 %v1380_v29, %v636_v43 }
 0x110   : > { %v363_v27 = vpop.permute.xlu1 %362  ;;  %v648_v38 = vpop.permute.xlu0 %647 }
 0x111   : > { %v365_v3 = vadd.f32 %v363_v27, %v358_v44  ;;  %v650_v54 = vadd.f32 %v648_v38, %v643_v16 }
 0x114   : > { %v370_v48 = vpop.permute.xlu1 %369  ;;  %v655_v47 = vpop.permute.xlu0 %654 }
 0x115   : > { %v372_v58 = vadd.f32 %v370_v48, %v365_v3  ;;  %v657_v7 = vadd.f32 %v655_v47, %v650_v54 }
 0x118   : > { %v374_v52 = vpop.permute.xlu1 %373  ;;  %v659_v41 = vpop.permute.xlu0 %658 }
 0x119   : > { %v376_v5 = vadd.f32 %v374_v52, %v372_v58  ;;  %v661_v15 = vadd.f32 %v659_v41, %v657_v7 }
 0x11c   : > { %v378_v37 = vpop.permute.xlu1 %377  ;;  %v225_v42 = vpop.permute.xlu0 %224 }
 0x11d   : > { %v380_v9 = vadd.f32 %v378_v37, %v376_v5  ;;  %231 = vst.msk [vmem:[%s123_s2 - $0x1] sm:$0xfe] %vm230_vm4, %v225_v42 }
 0x11f   : > { %v803_v59 = vclamps-f32 %v380_v9, 3.0 }
 0x120   : > { %v227_v30 = vpop.permute.xlu1 %226  ;;  %v663_v29 = vpop.permute.xlu0 %662 }
 0x121   : > { %804 = vst.msk [vmem:[%s123_s2 + $0x10] sm:$0xff] %vm384_vm5, %v803_v59  ;;  %v665_v36 = vadd.f32 %v663_v29, %v661_v15 }
 0x122   : > { %233 = vst.msk [vmem:[%s123_s2 + $0x7] sm:$0x1] %vm232_vm6, %v227_v30 }
 0x123   : > { %v813_v60 = vclamps-f32 %v665_v36, 3.0 }
 0x125   : > { %814 = vst.msk [vmem:[%s123_s2 + $0x18] sm:$0xff] %vm384_vm5, %v813_v60 }
 0x13b   : > { %v413_v63 = vpop.permute.xlu1 %412  ;;  %v411_v25 = vpop.permute.xlu0 %410 }
 0x13c   : > { %808 = vst.msk [vmem:[%s123_s2 + $0x26] sm:$0x3] %vm419_vm7, %v413_v63 }
 0x13d   : > { %807 = vst.msk [vmem:[%s123_s2 + $0x1e] sm:$0xfc] %vm417_vm8, %v411_v25 }
 0x13f   : > { %v516_v20 = vpop.permute.xlu1 %515  ;;  %v514_v21 = vpop.permute.xlu0 %513 }
 0x140   : > { %520 = vst.msk [vmem:[%s123_s2 + $0xf] sm:$0x1] %vm232_vm6, %v516_v20 }
 0x141   : > { %519 = vst.msk [vmem:[%s123_s2 + $0x7] sm:$0xfe] %vm230_vm4, %v514_v21 }
 0x143   : > { %v696_v18 = vpop.permute.xlu1 %695  ;;  %v694_v12 = vpop.permute.xlu0 %693 }
 0x144   : > { %818 = vst.msk [vmem:[%s123_s2 + $0x2e] sm:$0x3] %vm419_vm7, %v696_v18 }
 0x145   : > { %817 = vst.msk [vmem:[%s123_s2 + $0x26] sm:$0xfc] %vm417_vm8, %v694_v12 }
 0x146   : > { %899 = shalt.err (!%p896_p5)
}
 0x147   : > { %s900_s22 = scalar_lea.hbm %s1424_s13, 768  ;;  %s904_s25 = scalar_lea.hbm %s1479_s1, 1536 }
 0x148   : > { %p901_p6 = scmp.ne.s32.totalorder %s1424_s13, %s900_s22  ;;  %p905_p10 = scmp.lt.u32.totalorder %s1424_s13, %s1479_s1 }
 0x149   : > { %p906_p11 = scmp.lt.u32.totalorder %s904_s25, %s900_s22  ;;  %p908_p13 = scmp.lt.u32.totalorder %s900_s22, %s1424_s13 }
 0x14a   : > { %p902_p7 = pnand %p901_p6, %p1023_p4 }
 0x14b   : > { %p907_p12 = por %p906_p11, %p905_p10 }
 0x14c   : > { %p903_p9 = pneg %p902_p7 }
 0x14d   : > { %p909_p0 = por %p908_p13, %p907_p12 }
 0x14f   : > { %p910_p1 = pnand %p909_p0, %p903_p9 }
 0x151   : > { %913 = shalt.err (!%p910_p1)
}
 0x152   : > { %s971_s28 = smov 128   ;;  %s972_s29 = smov 8  }
 0x153   : > { %825 = dma.vmem_to_hbm [thread:$0]  (%p1023_p4), %s1426_s4, 768, %s1424_s13, %s1432_s9, %s971_s28, %s971_s28, %s972_s29  }
 0x154 PF: > { %p831_p2 = scmp.ge.s32.totalorder %s964_s11, 2  ;;  %s732_s30 = sand.u32 1, %s944_s6  }
 0x155   : > { %s733_s2 = scalar_lea.sflag [#allocation3], %s732_s30 }
 0x156   : > { %p828_p3 = pnand %p831_p2, %p1030_p8 }
 0x158   : > { %939 = dma.done.wait (!%p828_p3), %s733_s2, 768  }
 0x159   : > { %941 = vsyncadd (!%p828_p3), %s733_s2, 4294966528  ;;  %s14_s11 = sadd.s32 1, %s964_s11   ;;  %s1482_s6 = smov %s948_s7 }
 0x15a   : > { %p11_p5 = scmp.ge.s32.totalorder %s14_s11, 4   ;;  %s1483_s7 = smov %s952_s8 }
 0x15b   : > { %s1484_s8 = smov %s1036_s19  ;;  %s1485_s9 = smov %s960_s10 }
 0x15c   : > { %s1486_s10 = smov %s1488_s14  ;;  %13 = sbr.rel (!%p11_p5) target bundleno = 4 (0x4), region = 63 }
 0x163   :  { %738 = vsyncpa [#allocation3], 1 }
 0x164   :  { %740 = vsyncpa [#allocation3 + $0x1], 1 }

</bundles_post_ra>
